<compile_context>
chip_gen: v5e
topology: v5e:2x2
jax: 0.10.0
libtpu: 0.0.40
codegen_flags: <defaults>
</compile_context>

<pallas_src>
import functools

import jax
import jax.numpy as jnp
from jax import lax
from jax.experimental import pallas as pl
from jax.experimental.pallas import tpu as pltpu


def taylor_ce_kernel(logits_ref, labels_ref, loss_ref, valid_ref,
                     denom_acc, fnlab_acc, *,
                     n, ignore_index, n_rows, n_cols, tile_m, tile_c):
    r = pl.program_id(0)            # row-tile index   ("parallel")
    c = pl.program_id(1)            # class-tile index ("arbitrary" reduction)

    # Reset the per-row accumulators at the start of each class sweep.
    @pl.when(c == 0)
    def _():
        denom_acc[...] = jnp.zeros_like(denom_acc)
        fnlab_acc[...] = jnp.zeros_like(fnlab_acc)

    x = logits_ref[...].astype(jnp.float32)      # (tile_m, tile_c), cast in-kernel
    labels = labels_ref[...]                     # (tile_m, 1) int32

    # Horner evaluation of fn = sum_{i=0..n} x^i / i! with precomputed 1/i!.
    inv_fact = [1.0]
    fact = 1.0
    for i in range(1, n + 1):
        fact *= float(i)
        inv_fact.append(1.0 / fact)
    fn = jnp.full(x.shape, inv_fact[n], dtype=jnp.float32)
    for i in range(n - 1, -1, -1):
        fn = fn * x + inv_fact[i]

    # Mask out-of-range class columns (ragged last class tile).
    col_ids = c * tile_c + lax.broadcasted_iota(jnp.int32, x.shape, 1)
    fn = jnp.where(col_ids < n_cols, fn, 0.0)

    # Accumulate softmax denominator and fn at the label column
    # (one-hot select: no dynamic lane gather on TPU).
    denom_acc[...] = denom_acc[...] + jnp.sum(fn, axis=1, keepdims=True)
    onehot = col_ids == labels
    fnlab_acc[...] = fnlab_acc[...] + jnp.sum(jnp.where(onehot, fn, 0.0),
                                              axis=1, keepdims=True)

    # Finalize the per-row loss on the last class tile (output blocks are
    # indexed only by r, so they are written exactly once per row tile).
    @pl.when(c == pl.num_programs(1) - 1)
    def _():
        row_ids = r * tile_m + lax.broadcasted_iota(jnp.int32, labels.shape, 0)
        row_valid = row_ids < n_rows                       # ragged last row tile
        valid = jnp.logical_and(labels != ignore_index, row_valid)
        safe_den = jnp.where(row_valid, denom_acc[...], 1.0)
        safe_lab = jnp.where(valid, fnlab_acc[...], 1.0)
        # -log(fn[label] / denom) = log(denom) - log(fn[label])
        loss_ref[...] = jnp.where(valid, jnp.log(safe_den) - jnp.log(safe_lab), 0.0)
        valid_ref[...] = valid.astype(jnp.float32)


def _choose_tiles(n_rows, n_cols, itemsize, *, max_tile_m, max_tile_c,
                  vmem_budget_bytes):
    # Class tile: full C when it fits (satisfies the "full dim" tiling rule for
    # any C), otherwise a lane-dense multiple of 128.
    tile_c = n_cols if n_cols <= max_tile_c else max_tile_c
    # Per-row VMEM bytes: 2x double-buffered logits tile + lane-padded (x128)
    # labels, two double-buffered outputs, and two f32 scratch columns.
    per_row = 2 * tile_c * itemsize + (2 + 2 * 2 + 2) * 128 * 4
    tile_m = vmem_budget_bytes // per_row
    tile_m = int(max(8, min(max_tile_m, (tile_m // 8) * 8)))
    if n_rows <= tile_m:
        tile_m = n_rows          # single row tile; full dim satisfies tiling rule
    return tile_m, tile_c


def taylor_cross_entropy_loss(logits, labels, *, n=2, ignore_index=-1,
                              reduction="mean", max_tile_m=1024,
                              max_tile_c=2048,
                              vmem_budget_bytes=16 * 1024 * 1024):
    assert n % 2 == 0, "TaylorSoftmax requires an even n"
    N, C = logits.shape
    labels2d = labels.reshape(N, 1).astype(jnp.int32)

    itemsize = jnp.dtype(logits.dtype).itemsize
    tile_m, tile_c = _choose_tiles(N, C, itemsize, max_tile_m=max_tile_m,
                                   max_tile_c=max_tile_c,
                                   vmem_budget_bytes=vmem_budget_bytes)
    num_row_tiles = pl.cdiv(N, tile_m)
    num_class_tiles = pl.cdiv(C, tile_c)

    # Explicit scoped-VMEM limit: double-buffered logits tiles plus the small
    # lane-padded label/output/scratch columns, with headroom; capped well
    # below v7x's 64 MiB physical VMEM.
    need = (2 * tile_m * tile_c * itemsize          # logits (double-buffered)
            + 2 * tile_m * 128 * 4                  # labels (lane-padded)
            + 2 * 2 * tile_m * 128 * 4              # two outputs (double-buffered)
            + 2 * tile_m * 128 * 4)                 # two f32 scratch columns
    vmem_limit = int(min(48 * 1024 * 1024, max(16 * 1024 * 1024, need + (4 << 20))))

    kernel = functools.partial(
        taylor_ce_kernel, n=n, ignore_index=ignore_index,
        n_rows=N, n_cols=C, tile_m=tile_m, tile_c=tile_c)

    per_row_loss, per_row_valid = pl.pallas_call(
        kernel,
        out_shape=(jax.ShapeDtypeStruct((N, 1), jnp.float32),
                   jax.ShapeDtypeStruct((N, 1), jnp.float32)),
        grid_spec=pltpu.PrefetchScalarGridSpec(
            num_scalar_prefetch=0,
            grid=(num_row_tiles, num_class_tiles),
            in_specs=[
                pl.BlockSpec((tile_m, tile_c), lambda r, c: (r, c)),
                pl.BlockSpec((tile_m, 1), lambda r, c: (r, 0)),
            ],
            out_specs=(
                pl.BlockSpec((tile_m, 1), lambda r, c: (r, 0)),
                pl.BlockSpec((tile_m, 1), lambda r, c: (r, 0)),
            ),
            scratch_shapes=[
                pltpu.VMEM((tile_m, 1), jnp.float32),   # softmax denominator acc
                pltpu.VMEM((tile_m, 1), jnp.float32),   # fn[label] accumulator
            ]),
        compiler_params=pltpu.CompilerParams(
            dimension_semantics=("parallel", "arbitrary"),
            vmem_limit_bytes=vmem_limit),
    )(logits, labels2d)   # logits streamed in native dtype (no wrapper astype)

    loss_sum = jnp.sum(per_row_loss)
    if reduction == "mean":
        # NOTE: all labels == ignore_index -> 0/0 -> NaN, matching PyTorch.
        return loss_sum / jnp.sum(per_row_valid)
    elif reduction == "sum":
        return loss_sum
    elif reduction == "none":
        return per_row_loss[:, 0]
    else:
        raise NotImplementedError(f"reduction={reduction}")


def _reference(logits, labels, *, n=2, ignore_index=-1):
    x = logits.astype(jnp.float32)
    fn = jnp.ones_like(x)
    denor = 1.0
    for i in range(1, n + 1):
        denor *= i
        fn = fn + x ** i / denor
    probs = fn / jnp.sum(fn, axis=1, keepdims=True)
    logp = jnp.log(probs)
    valid = labels != ignore_index
    safe_labels = jnp.where(valid, labels, 0)
    picked = jnp.take_along_axis(logp, safe_labels[:, None], axis=1)[:, 0]
    losses = jnp.where(valid, -picked, 0.0)
    return jnp.sum(losses) / jnp.sum(valid.astype(jnp.float32))


if __name__ == "__main__":
    key = jax.random.PRNGKey(0)
    k1, k2, k3, k4 = jax.random.split(key, 4)

    # Small shape consistent with the module usage: 16 samples, 32 classes, n=2.
    N, C, n_taylor, ignore_index = 16, 32, 2, -1
    logits = jax.random.normal(k1, (N, C), dtype=jnp.float32)
    labels = jax.random.randint(k2, (N,), 0, C, dtype=jnp.int32)
    labels = labels.at[3].set(ignore_index)            # exercise ignore_index

    loss = taylor_cross_entropy_loss(
        logits, labels, n=n_taylor, ignore_index=ignore_index, reduction="mean")
    loss = jax.block_until_ready(loss)
    ref = _reference(logits, labels, n=n_taylor, ignore_index=ignore_index)
    assert jnp.allclose(loss, ref, atol=1e-5, rtol=1e-5), (loss, ref)

    # Second small check: force tiny tile caps so the ragged-row and
    # class-tiling mask paths are exercised at toy shapes.
    N2, C2 = 20, 160
    logits2 = jax.random.normal(k3, (N2, C2), dtype=jnp.float32)
    labels2 = jax.random.randint(k4, (N2,), 0, C2, dtype=jnp.int32)
    labels2 = labels2.at[7].set(ignore_index)
    loss2 = taylor_cross_entropy_loss(
        logits2, labels2, n=n_taylor, ignore_index=ignore_index,
        reduction="mean", max_tile_m=8, max_tile_c=128)
    loss2 = jax.block_until_ready(loss2)
    ref2 = _reference(logits2, labels2, n=n_taylor, ignore_index=ignore_index)
    assert jnp.allclose(loss2, ref2, atol=1e-5, rtol=1e-5), (loss2, ref2)

    print("KERNEL_OK")
</pallas_src>

<mosaic_0001>
module attributes {stable_mosaic.version = 11 : i64} {
  func.func @taylor_ce_kernel(%arg0: i32, %arg1: i32, %arg2: memref<16x32xf32, #tpu.memory_space<vmem>>, %arg3: memref<16x1xi32, #tpu.memory_space<vmem>>, %arg4: memref<16x1xf32, #tpu.memory_space<vmem>>, %arg5: memref<16x1xf32, #tpu.memory_space<vmem>>, %arg6: memref<16x1xf32, #tpu.memory_space<vmem>>, %arg7: memref<16x1xf32, #tpu.memory_space<vmem>>) attributes {dimension_semantics = [#tpu.dimension_semantics<parallel>, #tpu.dimension_semantics<arbitrary>], iteration_bounds = array<i64: 1, 1>, scalar_prefetch = 0 : i64, scratch_operands = 2 : i64, tpu.core_type = #tpu.core_type<tc>, window_params = [{transform_indices = @transform_0, window_bounds = array<i64: 16, 32>}, {transform_indices = @transform_1, window_bounds = array<i64: 16, 1>}, {transform_indices = @transform_2, window_bounds = array<i64: 16, 1>}, {transform_indices = @transform_3, window_bounds = array<i64: 16, 1>}]} {
    %c0_i32 = arith.constant 0 : i32
    %0 = arith.cmpi eq, %arg1, %c0_i32 : i32
    %1 = arith.extui %0 : i1 to i32
    %c0_i32_0 = arith.constant 0 : i32
    %2 = arith.cmpi ne, %1, %c0_i32_0 : i32
    scf.if %2 {
      %cst_21 = arith.constant 0.000000e+00 : f32
      %37 = vector.broadcast %cst_21 : f32 to vector<16x1xf32>
      %c0_22 = arith.constant 0 : index
      %c0_23 = arith.constant 0 : index
      %38 = vector.load %arg6[%c0_22, %c0_23] : memref<16x1xf32, #tpu.memory_space<vmem>>, vector<16x1xf32>
      tpu.vector_store %arg6[%c0_22, %c0_23], %37 {strides = array<i32>} : memref<16x1xf32, #tpu.memory_space<vmem>>, vector<16x1xf32>,
      %cst_24 = arith.constant 0.000000e+00 : f32
      %39 = vector.broadcast %cst_24 : f32 to vector<16x1xf32>
      %c0_25 = arith.constant 0 : index
      %c0_26 = arith.constant 0 : index
      %40 = vector.load %arg7[%c0_25, %c0_26] : memref<16x1xf32, #tpu.memory_space<vmem>>, vector<16x1xf32>
      tpu.vector_store %arg7[%c0_25, %c0_26], %39 {strides = array<i32>} : memref<16x1xf32, #tpu.memory_space<vmem>>, vector<16x1xf32>,
    } else {
    }
    %c0 = arith.constant 0 : index
    %c0_1 = arith.constant 0 : index
    %3 = vector.load %arg2[%c0, %c0_1] : memref<16x32xf32, #tpu.memory_space<vmem>>, vector<16x32xf32>
    %c0_2 = arith.constant 0 : index
    %c0_3 = arith.constant 0 : index
    %4 = vector.load %arg3[%c0_2, %c0_3] : memref<16x1xi32, #tpu.memory_space<vmem>>, vector<16x1xi32>
    %cst = arith.constant 5.000000e-01 : f32
    %5 = vector.broadcast %cst : f32 to vector<16x32xf32>
    %6 = arith.mulf %5, %3 : vector<16x32xf32>
    %cst_4 = arith.constant 1.000000e+00 : f32
    %7 = vector.broadcast %cst_4 : f32 to vector<16x32xf32>
    %8 = arith.addf %6, %7 : vector<16x32xf32>
    %9 = arith.mulf %8, %3 : vector<16x32xf32>
    %cst_5 = arith.constant 1.000000e+00 : f32
    %10 = vector.broadcast %cst_5 : f32 to vector<16x32xf32>
    %11 = arith.addf %9, %10 : vector<16x32xf32>
    %c32_i32 = arith.constant 32 : i32
    %12 = arith.muli %arg1, %c32_i32 : i32
    %13 = tpu.iota {dimensions = array<i32: 1>} : vector<16x32xi32>
    %14 = vector.broadcast %12 : i32 to vector<16x32xi32>
    %15 = arith.addi %14, %13 : vector<16x32xi32>
    %c32_i32_6 = arith.constant 32 : i32
    %16 = vector.broadcast %c32_i32_6 : i32 to vector<16x32xi32>
    %17 = arith.cmpi slt, %15, %16 : vector<16x32xi32>
    %cst_7 = arith.constant 0.000000e+00 : f32
    %18 = vector.broadcast %cst_7 : f32 to vector<16x32xf32>
    %19 = arith.select %17, %11, %18 : vector<16x32xi1>, vector<16x32xf32>
    %c0_8 = arith.constant 0 : index
    %c0_9 = arith.constant 0 : index
    %20 = vector.load %arg6[%c0_8, %c0_9] : memref<16x1xf32, #tpu.memory_space<vmem>>, vector<16x1xf32>
    %cst_10 = arith.constant dense<0.000000e+00> : vector<16xf32>
    %21 = vector.multi_reduction <add>, %19, %cst_10 [1] : vector<16x32xf32> to vector<16xf32>
    %22 = vector.shape_cast %21 : vector<16xf32> to vector<16x1xf32>
    %23 = arith.addf %20, %22 : vector<16x1xf32>
    %c0_11 = arith.constant 0 : index
    %c0_12 = arith.constant 0 : index
    %24 = vector.load %arg6[%c0_11, %c0_12] : memref<16x1xf32, #tpu.memory_space<vmem>>, vector<16x1xf32>
    tpu.vector_store %arg6[%c0_11, %c0_12], %23 {strides = array<i32>} : memref<16x1xf32, #tpu.memory_space<vmem>>, vector<16x1xf32>,
    %25 = vector.broadcast %4 : vector<16x1xi32> to vector<16x32xi32>
    %26 = arith.cmpi eq, %15, %25 : vector<16x32xi32>
    %c0_13 = arith.constant 0 : index
    %c0_14 = arith.constant 0 : index
    %27 = vector.load %arg7[%c0_13, %c0_14] : memref<16x1xf32, #tpu.memory_space<vmem>>, vector<16x1xf32>
    %cst_15 = arith.constant 0.000000e+00 : f32
    %28 = vector.broadcast %cst_15 : f32 to vector<16x32xf32>
    %29 = arith.select %26, %19, %28 : vector<16x32xi1>, vector<16x32xf32>
    %cst_16 = arith.constant dense<0.000000e+00> : vector<16xf32>
    %30 = vector.multi_reduction <add>, %29, %cst_16 [1] : vector<16x32xf32> to vector<16xf32>
    %31 = vector.shape_cast %30 : vector<16xf32> to vector<16x1xf32>
    %32 = arith.addf %27, %31 : vector<16x1xf32>
    %c0_17 = arith.constant 0 : index
    %c0_18 = arith.constant 0 : index
    %33 = vector.load %arg7[%c0_17, %c0_18] : memref<16x1xf32, #tpu.memory_space<vmem>>, vector<16x1xf32>
    tpu.vector_store %arg7[%c0_17, %c0_18], %32 {strides = array<i32>} : memref<16x1xf32, #tpu.memory_space<vmem>>, vector<16x1xf32>,
    %c0_i32_19 = arith.constant 0 : i32
    %34 = arith.cmpi eq, %arg1, %c0_i32_19 : i32
    %35 = arith.extui %34 : i1 to i32
    %c0_i32_20 = arith.constant 0 : i32
    %36 = arith.cmpi ne, %35, %c0_i32_20 : i32
    scf.if %36 {
      %c16_i32 = arith.constant 16 : i32
      %37 = arith.muli %arg0, %c16_i32 : i32
      %38 = tpu.iota {dimensions = array<i32: 0>} : vector<16x1xi32>
      %39 = vector.broadcast %37 : i32 to vector<16x1xi32>
      %40 = arith.addi %39, %38 : vector<16x1xi32>
      %c16_i32_21 = arith.constant 16 : i32
      %41 = vector.broadcast %c16_i32_21 : i32 to vector<16x1xi32>
      %42 = arith.cmpi slt, %40, %41 : vector<16x1xi32>
      %c-1_i32 = arith.constant -1 : i32
      %43 = vector.broadcast %c-1_i32 : i32 to vector<16x1xi32>
      %44 = arith.cmpi ne, %4, %43 : vector<16x1xi32>
      %45 = arith.andi %44, %42 : vector<16x1xi1>
      %c0_22 = arith.constant 0 : index
      %c0_23 = arith.constant 0 : index
      %46 = vector.load %arg6[%c0_22, %c0_23] : memref<16x1xf32, #tpu.memory_space<vmem>>, vector<16x1xf32>
      %cst_24 = arith.constant 1.000000e+00 : f32
      %47 = vector.broadcast %cst_24 : f32 to vector<16x1xf32>
      %48 = arith.select %42, %46, %47 : vector<16x1xi1>, vector<16x1xf32>
      %c0_25 = arith.constant 0 : index
      %c0_26 = arith.constant 0 : index
      %49 = vector.load %arg7[%c0_25, %c0_26] : memref<16x1xf32, #tpu.memory_space<vmem>>, vector<16x1xf32>
      %cst_27 = arith.constant 1.000000e+00 : f32
      %50 = vector.broadcast %cst_27 : f32 to vector<16x1xf32>
      %51 = arith.select %45, %49, %50 : vector<16x1xi1>, vector<16x1xf32>
      %52 = math.log %48 : vector<16x1xf32>
      %53 = math.log %51 : vector<16x1xf32>
      %54 = arith.subf %52, %53 : vector<16x1xf32>
      %cst_28 = arith.constant 0.000000e+00 : f32
      %55 = vector.broadcast %cst_28 : f32 to vector<16x1xf32>
      %56 = arith.select %45, %54, %55 : vector<16x1xi1>, vector<16x1xf32>
      %c0_29 = arith.constant 0 : index
      %c0_30 = arith.constant 0 : index
      %57 = vector.load %arg4[%c0_29, %c0_30] : memref<16x1xf32, #tpu.memory_space<vmem>>, vector<16x1xf32>
      tpu.vector_store %arg4[%c0_29, %c0_30], %56 {strides = array<i32>} : memref<16x1xf32, #tpu.memory_space<vmem>>, vector<16x1xf32>,
      %58 = arith.extui %45 : vector<16x1xi1> to vector<16x1xi32>
      %59 = arith.sitofp %58 : vector<16x1xi32> to vector<16x1xf32>
      %c0_31 = arith.constant 0 : index
      %c0_32 = arith.constant 0 : index
      %60 = vector.load %arg5[%c0_31, %c0_32] : memref<16x1xf32, #tpu.memory_space<vmem>>, vector<16x1xf32>
      tpu.vector_store %arg5[%c0_31, %c0_32], %59 {strides = array<i32>} : memref<16x1xf32, #tpu.memory_space<vmem>>, vector<16x1xf32>,
    } else {
    }
    return
  }
  func.func @transform_0(%arg0: i32, %arg1: i32) -> (i32, i32) {
    %c0_i32 = arith.constant 0 : i32
    return %arg0, %arg1 : i32, i32
  }
  func.func @transform_1(%arg0: i32, %arg1: i32) -> (i32, i32) {
    %c0_i32 = arith.constant 0 : i32
    %c0_i32_0 = arith.constant 0 : i32
    return %arg0, %c0_i32 : i32, i32
  }
  func.func @transform_2(%arg0: i32, %arg1: i32) -> (i32, i32) {
    %c0_i32 = arith.constant 0 : i32
    %c0_i32_0 = arith.constant 0 : i32
    return %arg0, %c0_i32 : i32, i32
  }
  func.func @transform_3(%arg0: i32, %arg1: i32) -> (i32, i32) {
    %c0_i32 = arith.constant 0 : i32
    %c0_i32_0 = arith.constant 0 : i32
    return %arg0, %c0_i32 : i32, i32
  }
}

</mosaic_0001>

<bundles_post_ra>
// kernel: tpu_custom_call.1
= control target key start
LH: loop header
LB: loop body
LE: loop exit
PB: predicated region body
PF: predicated region fallthrough
CT: control target
= control target key end

     0   :  { %vm17_vm0 = vcmask 7168   ;;  %v143_v0 = vmov 0   ;;  %v144_v2 = vmov 0.0   ;;  %v35_v6 = vlaneseq  ;;  %s225_s1 = inlined_call_operand.vmem [shape: s32[16,1], index: 1, kind: input, shape index: {}]   ;;  %s226_s3 = inlined_call_operand.vmem [shape: f32[16,1], index: 3, kind: output, shape index: {1}]   ;;  %s227_s0 = inlined_call_operand.vmem [shape: f32[16,32], index: 0, kind: input, shape index: {}]   ;;  %s228_s2 = inlined_call_operand.vmem [shape: f32[16,1], index: 2, kind: output, shape index: {0}]  }
   0x1   :  { %134 = vset.pattern.permute.xlu0 %v143_v0  ;;  %v168_v1 = vld [vmem:[%s225_s1] sm:$0xff]  ;;  %18 = vst.msk [vmem:[#allocation2] sm:$0xff] %vm17_vm0, %v144_v2  ;;  %v174_v3 = vld [vmem:[%s225_s1 + $0x8] sm:$0xff]  ;;  %vm44_vm4 = vcmask 261120  }
   0x2   :  { %57 = vperm.xlu0 %134, %v168_v1   ;;  %vm90_vm1 = vcmp.ne.s32.totalorder %v168_v1, 4294967295  ;;  %19 = vst.msk [vmem:[#allocation2 + $0x8] sm:$0xff] %vm17_vm0, %v144_v2  ;;  %vm91_vm2 = vcmp.ne.s32.totalorder %v174_v3, 4294967295  ;;  %v22_v7 = vld [vmem:[%s227_s0] sm:$0xff]  ;;  %v36_v10 = vand.u32 127, %v35_v6  ;;  %v23_v13 = vld [vmem:[%s227_s0 + $0x8] sm:$0xff] }
   0x3   :  { %v130_v4 = vsel %vm90_vm1, 1.0, %v144_v2  ;;  %20 = vst.msk [vmem:[#allocation3] sm:$0xff] %vm17_vm0, %v144_v2  ;;  %v131_v5 = vsel %vm91_vm2, 1.0, %v144_v2  ;;  %v26_v8 = vmul.f32 0.5, %v22_v7  ;;  %v27_v14 = vmul.f32 0.5, %v23_v13 }
   0x4   :  { %120 = vst.msk [vmem:[%s226_s3] sm:$0xff] %vm17_vm0, %v130_v4  ;;  %vm39_vm3 = vcmp.lt.s32.totalorder %v36_v10, 32 }
   0x5   :  { %21 = vst.msk [vmem:[#allocation3 + $0x8] sm:$0xff] %vm17_vm0, %v144_v2  ;;  %v28_v9 = vadd.f32 1.0, %v26_v8  ;;  %v29_v16 = vadd.f32 1.0, %v27_v14 }
   0x6   :  { %121 = vst.msk [vmem:[%s226_s3 + $0x8] sm:$0xff] %vm17_vm0, %v131_v5 }
   0x7   :  { %v30_v11 = vmul.f32 %v28_v9, %v22_v7  ;;  %v31_v18 = vmul.f32 %v29_v16, %v23_v13 }
   0x8   :  { %v42_v28 = vld [vmem:[#allocation2] sm:$0xff] }
   0x9   :  { %v32_v12 = vadd.f32 1.0, %v30_v11  ;;  %v33_v19 = vadd.f32 1.0, %v31_v18  ;;  %v43_v31 = vld [vmem:[#allocation2 + $0x8] sm:$0xff] }
   0xa   :  { %60 = vperm.xlu0 %134, %v174_v3   ;;  %v64_v34 = vld [vmem:[#allocation3] sm:$0xff] }
   0xb   :  { %v40_v15 = vsel %vm39_vm3, %v32_v12, 0.0  ;;  %v41_v20 = vsel %vm39_vm3, %v33_v19, 0.0 }
   0xc   :  { %v45_v17 = vsel %vm44_vm4, %v40_v15, 0.0  ;;  %v48_v21 = vsel %vm44_vm4, %v41_v20, 0.0  ;;  %v65_v38 = vld [vmem:[#allocation3 + $0x8] sm:$0xff] }
   0xd   :  { %46 = vadd.xlane.f32.xlu2 %v45_v17 }
  0x15   :  { %49 = vadd.xlane.f32.xlu2 %v48_v21 }
  0x74   :  { %v58_v22 = vpop.permute.xlu0 %57 }
  0x75   :  { %vm62_vm5 = vcmp.eq.s32.totalorder %v36_v10, %v58_v22 }
  0x76   :  { %v66_v23 = vsel %vm62_vm5, %v40_v15, 0.0 }
  0x77   :  { %v68_v24 = vsel %vm44_vm4, %v66_v23, 0.0 }
  0x78   :  { %69 = vadd.xlane.f32.xlu1 %v68_v24 }
  0x7c   :  { %v61_v25 = vpop.permute.xlu0 %60 }
  0x7d   :  { %vm63_vm6 = vcmp.eq.s32.totalorder %v36_v10, %v61_v25 }
  0x7e   :  { %v67_v26 = vsel %vm63_vm6, %v41_v20, 0.0 }
  0x7f   :  { %v71_v27 = vsel %vm44_vm4, %v67_v26, 0.0 }
  0x80   :  { %72 = vadd.xlane.f32.xlu1 %v71_v27  ;;  %v47_v29 = vpop.xlane.xlu2 %46 }
  0x81   :  { %v51_v30 = vadd.f32 %v47_v29, %v42_v28 }
  0x83   :  { %54 = vst.msk [vmem:[#allocation2] sm:$0xff] %vm17_vm0, %v51_v30 }
  0x88   :  { %v50_v32 = vpop.xlane.xlu2 %49 }
  0x89   :  { %v52_v33 = vadd.f32 %v50_v32, %v43_v31 }
  0x8a   :  { %v94_v37 = vld [vmem:[#allocation2] sm:$0xff] }
  0x8b   :  { %55 = vst.msk [vmem:[#allocation2 + $0x8] sm:$0xff] %vm17_vm0, %v52_v33  ;;  %135 = vlog2.f32 %v94_v37 }
  0x91   :  { %v136_v44 = vpop.eup %135 }
  0x92   :  { %v95_v43 = vld [vmem:[#allocation2 + $0x8] sm:$0xff]  ;;  %v103_v45 = vmul.f32 0.6931472, %v136_v44 }
  0xeb   :  { %v70_v35 = vpop.xlane.xlu1 %69 }
  0xec   :  { %v74_v36 = vadd.f32 %v70_v35, %v64_v34 }
  0xee   :  { %76 = vst.msk [vmem:[#allocation3] sm:$0xff] %vm17_vm0, %v74_v36 }
  0xf3   :  { %v73_v39 = vpop.xlane.xlu1 %72 }
  0xf4   :  { %v75_v40 = vadd.f32 %v73_v39, %v65_v38 }
  0xf5   :  { %v98_v41 = vld [vmem:[#allocation3] sm:$0xff] }
  0xf6   :  { %v100_v42 = vsel %vm90_vm1, %v98_v41, 1.0  ;;  %77 = vst.msk [vmem:[#allocation3 + $0x8] sm:$0xff] %vm17_vm0, %v75_v40 }
  0xf7   :  { %137 = vlog2.f32 %v100_v42 }
  0xf8   :  { %139 = vlog2.f32 %v95_v43 }
  0xfd   :  { %v138_v46 = vpop.eup %137  ;;  %v99_v47 = vld [vmem:[#allocation3 + $0x8] sm:$0xff] }
  0xfe   :  { %v107_v48 = vmul.f32 0.6931472, %v138_v46  ;;  %v101_v49 = vsel %vm91_vm2, %v99_v47, 1.0  ;;  %v140_v51 = vpop.eup %139 }
  0xff   :  { %141 = vlog2.f32 %v101_v49  ;;  %v105_v53 = vmul.f32 0.6931472, %v140_v51 }
 0x100   :  { %v110_v50 = vsub.f32 %v103_v45, %v107_v48 }
 0x102   :  { %v112_v52 = vsel %vm90_vm1, %v110_v50, 0.0 }
 0x103   :  { %114 = vst.msk [vmem:[%s228_s2] sm:$0xff] %vm17_vm0, %v112_v52 }
 0x105   :  { %v142_v54 = vpop.eup %141 }
 0x106   :  { %v109_v55 = vmul.f32 0.6931472, %v142_v54 }
 0x108   :  { %v111_v56 = vsub.f32 %v105_v53, %v109_v55 }
 0x10a   :  { %v113_v57 = vsel %vm91_vm2, %v111_v56, 0.0 }
 0x10b   :  { %115 = vst.msk [vmem:[%s228_s2 + $0x8] sm:$0xff] %vm17_vm0, %v113_v57 }

</bundles_post_ra>
